<compile_context>
chip_gen: v7x
topology: tpu7x:2x2x1
jax: 0.10.0
libtpu: 0.0.40
codegen_flags: <defaults>
</compile_context>

<pallas_src>
import jax
import jax.numpy as jnp
import numpy as np
from jax.experimental import pallas as pl
from jax.experimental.pallas import tpu as pltpu

LN_EPS = 1e-5


def _round_up(x, m):
    return ((x + m - 1) // m) * m


def _layer_norm(x, w, b):
    mu = jnp.mean(x, axis=-1, keepdims=True)
    var = jnp.mean(jnp.square(x - mu), axis=-1, keepdims=True)
    return (x - mu) * jax.lax.rsqrt(var + LN_EPS) * w + b


def _gelu(x):
    # exact (erf) gelu to match torch.nn.functional.gelu default.
    # (If a v5e bundle dump shows VALU saturation, approximate=True moves the
    #  transcendental to the EUP slot — at the cost of a small numerics delta.)
    return jax.nn.gelu(x, approximate=False)


def _pick_vmem_limit():
    """Per-generation scoped-VMEM budget (v7x: <=~48 MiB of 64; v5e/v6e: ~96 of 128)."""
    try:
        cap = pltpu.get_tpu_info().vmem_capacity_bytes
    except Exception:
        cap = 64 * 1024 * 1024  # conservative fallback (fits every generation)
    return int(min(cap * 3 // 4, 100 * 1024 * 1024))


# --------------------------------------------------------------------------
# Prologue kernel: y = output_proj(output_embeddings), computed exactly once.
# --------------------------------------------------------------------------
def output_proj_kernel(oemb_ref, wo_ref, bo_ref, y_ref):
    y = jnp.dot(oemb_ref[...], wo_ref[...],
                preferred_element_type=jnp.float32) + bo_ref[...]
    y_ref[...] = y.astype(y_ref.dtype)


# --------------------------------------------------------------------------
# Main kernel: MLP hoisted out of the M loop, cached in VMEM scratch.
# Grid = (row tiles i, candidate tiles j); i "parallel", j "arbitrary".
# --------------------------------------------------------------------------
def tree_gen_kernel(q_ref, par_ref, child_ref, y_ref,
                    wpp_ref, bpp_ref, w1q_ref, w1p_ref, w1c_ref, w2_ref,
                    slab_ref, out_ref, h_ref):
    f32 = jnp.float32
    bf16 = jnp.bfloat16

    # h depends only on the row tile -> compute once per i (first j iteration).
    @pl.when(pl.program_id(1) == 0)
    def _compute_h():
        slab = slab_ref[...]          # rows = [b1, b2, lnw, lnb]  (f32)
        b1 = slab[0:1]
        b2 = slab[1:2]
        lnw = slab[2:3]
        lnb = slab[3:4]

        # TODO(synk): dropout omitted (eval-mode identity); training-mode
        # dropout would need pltpu.prng_seed / pltpu.prng_random_bits.

        # parent_proj (kept as an explicit small matmul; not folded into w1)
        p = jnp.dot(par_ref[...], wpp_ref[...],
                    preferred_element_type=f32) + bpp_ref[...]

        # linear1 over the virtual concat [q | p | child] -> split weights,
        # no concatenation ever materialized.
        h = (jnp.dot(q_ref[...], w1q_ref[...], preferred_element_type=f32)
             + jnp.dot(p.astype(bf16), w1p_ref[...], preferred_element_type=f32)
             + jnp.dot(child_ref[...], w1c_ref[...], preferred_element_type=f32)
             + b1)
        h = _layer_norm(_gelu(h), lnw, lnb)

        # linear2 (the module re-applies the SAME LayerNorm params)
        h = jnp.dot(h.astype(bf16), w2_ref[...], preferred_element_type=f32) + b2
        h = _layer_norm(_gelu(h), lnw, lnb)

        h_ref[...] = h.astype(h_ref.dtype)

    # predictions tile = h @ y.T — contract H of both operands (trans-B
    # semantics), so no transpose is materialized.
    out_ref[...] = jax.lax.dot_general(
        h_ref[...], y_ref[...],
        dimension_numbers=(((1,), (1,)), ((), ())),
        preferred_element_type=jnp.float32,
    ).astype(out_ref.dtype)


def tree_gen_head(q_emb, parent_emb, child_emb, output_emb, params):
    N, D = q_emb.shape
    C = child_emb.shape[1]
    M = output_emb.shape[0]
    P = params["wpp"].shape[1]
    H = params["w2"].shape[1]
    bf16 = jnp.bfloat16

    # ---- tiling (lane-dense output; >=2 row tiles when possible for v7x) ----
    if N >= 16:
        TN = min(512, _round_up((N + 1) // 2, 8))
    else:
        TN = _round_up(max(N, 1), 8)
    TM = min(1024, _round_up(M, 128))
    N_pad = _round_up(N, TN)
    M_pad = _round_up(M, TM)

    # ---- inputs: cast to bf16 FIRST, then pad rows (halves wrapper traffic,
    #      no host-side concat at all) ----
    q_p = jnp.pad(q_emb.astype(bf16), ((0, N_pad - N), (0, 0)))
    par_p = jnp.pad(parent_emb.astype(bf16), ((0, N_pad - N), (0, 0)))
    ch_p = jnp.pad(child_emb.astype(bf16), ((0, N_pad - N), (0, 0)))
    oemb_p = jnp.pad(output_emb.astype(bf16), ((0, M_pad - M), (0, 0)))

    # ---- weights: split w1 into its [q | p | child] blocks; bf16 for MXU ----
    w1 = params["w1"]
    w1q = w1[:D].astype(bf16)                 # (D, H)
    w1p = w1[D:D + P].astype(bf16)            # (P, H)
    w1c = w1[D + P:].astype(bf16)             # (C, H)
    wpp = params["wpp"].astype(bf16)          # (D, P)
    bpp = params["bpp"].astype(jnp.float32)   # (1, P)
    w2 = params["w2"].astype(bf16)            # (H, H)
    wo = params["wo"].astype(bf16)            # (D, H)
    bo = params["bo"].astype(jnp.float32)     # (1, H)
    # tiny per-feature params packed into one slab -> one DMA
    slab = jnp.concatenate(
        [params["b1"], params["b2"], params["lnw"], params["lnb"]],
        axis=0).astype(jnp.float32)           # (4, H)

    vmem_limit = _pick_vmem_limit()

    # ---- prologue: y = output_emb @ wo + bo, computed once over M tiles ----
    y = pl.pallas_call(
        output_proj_kernel,
        out_shape=jax.ShapeDtypeStruct((M_pad, H), bf16),
        grid_spec=pltpu.PrefetchScalarGridSpec(
            num_scalar_prefetch=0,
            grid=(M_pad // TM,),
            in_specs=[
                pl.BlockSpec((TM, D), lambda j: (j, 0)),
                pl.BlockSpec((D, H), lambda j: (0, 0)),
                pl.BlockSpec((1, H), lambda j: (0, 0)),
            ],
            out_specs=pl.BlockSpec((TM, H), lambda j: (j, 0)),
        ),
        compiler_params=pltpu.CompilerParams(
            dimension_semantics=("parallel",),
            vmem_limit_bytes=vmem_limit,
        ),
        cost_estimate=pl.CostEstimate(
            flops=2 * M_pad * D * H,
            transcendentals=0,
            bytes_accessed=int(oemb_p.size * 2 + wo.size * 2 + bo.size * 4
                               + M_pad * H * 2),
        ),
    )(oemb_p, wo, bo)

    # ---- main kernel ----
    grid = (N_pad // TN, M_pad // TM)

    # Executed-work cost (MLP once per row, y streamed once per row tile,
    # only h@y.T scales with the full grid).
    mlp_flops = 2 * N_pad * (D * P + D * H + P * H + C * H + H * H)
    mm_flops = 2 * N_pad * M_pad * H
    weight_bytes = (2 * (wpp.size + w1q.size + w1p.size + w1c.size + w2.size)
                    + 4 * (bpp.size + slab.size))
    cost = pl.CostEstimate(
        flops=int(mlp_flops + mm_flops),
        transcendentals=int(2 * N_pad * H),
        bytes_accessed=int(
            2 * (q_p.size + par_p.size + ch_p.size)         # row inputs, once
            + (N_pad // TN) * M_pad * H * 2                  # y per row tile
            + weight_bytes
            + N_pad * M_pad * 4),                            # output writeback
    )

    # NOTE: the constant-index weight blocks below could take
    # pipeline_mode=pl.Buffered(1) to avoid double-buffering; at this module's
    # default sizes (D=768, H=P=300) all weights are < ~1.5 MiB bf16, so the
    # saving is negligible — enable it only for much larger H (>= 2k).
    out = pl.pallas_call(
        tree_gen_kernel,
        # TODO(synk): output kept f32 for fidelity with the PyTorch logits;
        # switch to bf16 if the downstream loss/argmax tolerates it (halves
        # the dominant HBM writeback).
        out_shape=jax.ShapeDtypeStruct((N_pad, M_pad), jnp.float32),
        grid_spec=pltpu.PrefetchScalarGridSpec(
            num_scalar_prefetch=0,
            grid=grid,
            in_specs=[
                pl.BlockSpec((TN, D), lambda i, j: (i, 0)),   # q
                pl.BlockSpec((TN, D), lambda i, j: (i, 0)),   # parent
                pl.BlockSpec((TN, C), lambda i, j: (i, 0)),   # child
                pl.BlockSpec((TM, H), lambda i, j: (j, 0)),   # y (precomputed)
                pl.BlockSpec((D, P), lambda i, j: (0, 0)),    # wpp
                pl.BlockSpec((1, P), lambda i, j: (0, 0)),    # bpp
                pl.BlockSpec((D, H), lambda i, j: (0, 0)),    # w1 (q block)
                pl.BlockSpec((P, H), lambda i, j: (0, 0)),    # w1 (parent block)
                pl.BlockSpec((C, H), lambda i, j: (0, 0)),    # w1 (child block)
                pl.BlockSpec((H, H), lambda i, j: (0, 0)),    # w2
                pl.BlockSpec((4, H), lambda i, j: (0, 0)),    # [b1,b2,lnw,lnb]
            ],
            out_specs=pl.BlockSpec((TN, TM), lambda i, j: (i, j)),
            scratch_shapes=[pltpu.VMEM((TN, H), bf16)],       # cached h
        ),
        compiler_params=pltpu.CompilerParams(
            # i parallel (megacore-shardable), j arbitrary so the h cache is
            # valid and reused across all candidate tiles.
            dimension_semantics=("parallel", "arbitrary"),
            vmem_limit_bytes=vmem_limit,
        ),
        cost_estimate=cost,
    )(q_p, par_p, ch_p, y, wpp, bpp, w1q, w1p, w1c, w2, slab)

    return out[:N, :M]


# --------------------------------------------------------------------------
# Parameter init + pure-JAX reference (f32 transcription of the PyTorch module)
# --------------------------------------------------------------------------
def _init_linear(key, fan_in, fan_out):
    kw, kb = jax.random.split(key)
    bound = 1.0 / np.sqrt(fan_in)
    w = jax.random.uniform(kw, (fan_in, fan_out), jnp.float32, -bound, bound)
    b = jax.random.uniform(kb, (1, fan_out), jnp.float32, -bound, bound)
    return w, b


def make_params(key, transformer_dim, parent_proj_size, hidden_size, child_num_emb_size):
    keys = jax.random.split(key, 5)
    wpp, bpp = _init_linear(keys[0], transformer_dim, parent_proj_size)
    cat_dim = transformer_dim + parent_proj_size + child_num_emb_size
    w1, b1 = _init_linear(keys[1], cat_dim, hidden_size)
    w2, b2 = _init_linear(keys[2], hidden_size, hidden_size)
    wo, bo = _init_linear(keys[3], transformer_dim, hidden_size)
    lnw = jnp.ones((1, hidden_size), jnp.float32)
    lnb = jnp.zeros((1, hidden_size), jnp.float32)
    return dict(wpp=wpp, bpp=bpp, w1=w1, b1=b1, w2=w2, b2=b2,
                lnw=lnw, lnb=lnb, wo=wo, bo=bo)


def reference_forward(q_emb, parent_emb, child_emb, output_emb, params):
    p = parent_emb @ params["wpp"] + params["bpp"]
    x = jnp.concatenate([q_emb, p, child_emb], axis=-1)
    x = x @ params["w1"] + params["b1"]
    x = jax.nn.gelu(x, approximate=False)
    x = _layer_norm(x, params["lnw"], params["lnb"])
    x = x @ params["w2"] + params["b2"]
    x = jax.nn.gelu(x, approximate=False)
    x = _layer_norm(x, params["lnw"], params["lnb"])
    y = output_emb @ params["wo"] + params["bo"]
    return x @ y.T


if __name__ == "__main__":
    # small shapes consistent with the module's forward
    transformer_dim = 32
    parent_proj_size = 16
    hidden_size = 32
    child_num_emb_size = 8
    N = 8   # number of query/parent rows (tree nodes)
    M = 8   # number of candidate output embeddings

    key = jax.random.PRNGKey(0)
    k_in, k_par = jax.random.split(key)
    kq, kp, kc, ko = jax.random.split(k_in, 4)

    q_emb = jax.random.normal(kq, (N, transformer_dim), jnp.float32)
    parent_emb = jax.random.normal(kp, (N, transformer_dim), jnp.float32)
    child_emb = jax.random.normal(kc, (N, child_num_emb_size), jnp.float32)
    output_emb = jax.random.normal(ko, (M, transformer_dim), jnp.float32)

    params = make_params(k_par, transformer_dim, parent_proj_size,
                         hidden_size, child_num_emb_size)

    preds = tree_gen_head(q_emb, parent_emb, child_emb, output_emb, params)
    preds = jax.block_until_ready(preds)

    ref = reference_forward(q_emb, parent_emb, child_emb, output_emb, params)
    assert preds.shape == (N, M)
    # bf16 MXU inputs with f32 accumulation: compare with a tolerance scaled to
    # the output magnitude (catches real bugs, tolerates bf16 rounding).
    err = float(jnp.max(jnp.abs(preds - ref)))
    scale = float(jnp.max(jnp.abs(ref)))
    assert err <= 2e-2 * scale + 5e-2, f"mismatch vs reference: err={err}, scale={scale}"

    print("KERNEL_OK")
</pallas_src>

<mosaic_0001>
module attributes {stable_mosaic.version = 11 : i64} {
  func.func @output_proj_kernel(%arg0: i32, %arg1: memref<128x32xbf16, #tpu.memory_space<vmem>>, %arg2: memref<32x32xbf16, #tpu.memory_space<vmem>>, %arg3: memref<1x32xf32, #tpu.memory_space<vmem>>, %arg4: memref<128x32xbf16, #tpu.memory_space<vmem>>) attributes {dimension_semantics = [#tpu.dimension_semantics<parallel>], iteration_bounds = array<i64: 1>, scalar_prefetch = 0 : i64, scratch_operands = 0 : i64, tpu.core_type = #tpu.core_type<tc>, window_params = [{transform_indices = @transform_0, window_bounds = array<i64: 128, 32>}, {pipeline_mode = #tpu.pipeline_mode<synchronous>, transform_indices = @transform_1, window_bounds = array<i64: 32, 32>}, {pipeline_mode = #tpu.pipeline_mode<synchronous>, transform_indices = @transform_2, window_bounds = array<i64: 1, 32>}, {transform_indices = @transform_3, window_bounds = array<i64: 128, 32>}]} {
    %c0 = arith.constant 0 : index
    %c0_0 = arith.constant 0 : index
    %0 = vector.load %arg1[%c0, %c0_0] : memref<128x32xbf16, #tpu.memory_space<vmem>>, vector<128x32xbf16>
    %c0_1 = arith.constant 0 : index
    %c0_2 = arith.constant 0 : index
    %1 = vector.load %arg2[%c0_1, %c0_2] : memref<32x32xbf16, #tpu.memory_space<vmem>>, vector<32x32xbf16>
    %cst = arith.constant dense<0.000000e+00> : vector<128x32xf32>
    %2 = tpu.matmul %0, %1, %cst {dimension_numbers = #tpu.dot_dimension_numbers<[1], [0], [0], [1], [0, 0, 1, 1], [], []>} : vector<128x32xbf16>, vector<32x32xbf16>, vector<128x32xf32> -> vector<128x32xf32>
    %c0_3 = arith.constant 0 : index
    %c0_4 = arith.constant 0 : index
    %3 = vector.load %arg3[%c0_3, %c0_4] : memref<1x32xf32, #tpu.memory_space<vmem>>, vector<1x32xf32>
    %4 = vector.broadcast %3 : vector<1x32xf32> to vector<128x32xf32>
    %5 = arith.addf %2, %4 : vector<128x32xf32>
    %6 = arith.truncf %5 : vector<128x32xf32> to vector<128x32xbf16>
    %c0_5 = arith.constant 0 : index
    %c0_6 = arith.constant 0 : index
    %7 = vector.load %arg4[%c0_5, %c0_6] : memref<128x32xbf16, #tpu.memory_space<vmem>>, vector<128x32xbf16>
    tpu.vector_store %arg4[%c0_5, %c0_6], %6 {strides = array<i32>} : memref<128x32xbf16, #tpu.memory_space<vmem>>, vector<128x32xbf16>,
    return
  }
  func.func @transform_0(%arg0: i32) -> (i32, i32) {
    %c0_i32 = arith.constant 0 : i32
    %c0_i32_0 = arith.constant 0 : i32
    return %arg0, %c0_i32 : i32, i32
  }
  func.func @transform_1(%arg0: i32) -> (i32, i32) {
    %c0_i32 = arith.constant 0 : i32
    %c0_i32_0 = arith.constant 0 : i32
    %c0_i32_1 = arith.constant 0 : i32
    return %c0_i32, %c0_i32_0 : i32, i32
  }
  func.func @transform_2(%arg0: i32) -> (i32, i32) {
    %c0_i32 = arith.constant 0 : i32
    %c0_i32_0 = arith.constant 0 : i32
    %c0_i32_1 = arith.constant 0 : i32
    return %c0_i32, %c0_i32_0 : i32, i32
  }
  func.func @transform_3(%arg0: i32) -> (i32, i32) {
    %c0_i32 = arith.constant 0 : i32
    %c0_i32_0 = arith.constant 0 : i32
    return %arg0, %c0_i32 : i32, i32
  }
}

</mosaic_0001>

<bundles_post_ra>
// kernel: tpu_custom_call.1
= control target key start
LH: loop header
LB: loop body
LE: loop exit
PB: predicated region body
PF: predicated region fallthrough
CT: control target
= control target key end

     0   :  { %vm94_vm0 = vcmask 261120   ;;  %vm280_vm1 = vcmask 257024   ;;  %s521_s1 = inlined_call_operand.vmem [shape: bf16[32,32], index: 1, kind: input, shape index: {}]   ;;  %s522_s0 = inlined_call_operand.vmem [shape: bf16[128,32], index: 0, kind: input, shape index: {}]   ;;  %s523_s2 = inlined_call_operand.vmem [shape: f32[1,32], index: 2, kind: input, shape index: {}]   ;;  %s524_s3 = inlined_call_operand.vmem [shape: bf16[128,32], index: 3, kind: output, shape index: {}]  }
   0x1   :  { %v386_v0 = vld [vmem:[%s521_s1] sm:$0xff]   ;;  %v387_v1 = vld [vmem:[%s521_s1 + $0x8] sm:$0xff]   ;;  %v392_v6 = vld [vmem:[%s522_s0 + $0x10] sm:$0xff]  }
   0x2   :  { %362 = vmatprep.subr.bf16.mxu0 %v386_v0  ;;  %382 = vmatprep.subr.bf16.mxu1 %v386_v0  ;;  %v388_v2 = vld [vmem:[%s522_s0] sm:$0xff]   ;;  %v390_v4 = vld [vmem:[%s522_s0 + $0x8] sm:$0xff]   ;;  %v393_v7 = vld [vmem:[%s522_s0 + $0x30] sm:$0xff]  }
   0x3   :  { %363 = vmatpush3.bf16.msra.mxu0 %v386_v0  ;;  %384 = vmatpush3.bf16.msra.mxu1 %v386_v0  ;;  %v389_v3 = vld [vmem:[%s522_s0 + $0x20] sm:$0xff]   ;;  %v391_v5 = vld [vmem:[%s522_s0 + $0x28] sm:$0xff]   ;;  %v394_v8 = vld [vmem:[%s522_s0 + $0x18] sm:$0xff]  }
   0x4   :  { %364 = vmatprep.subr.bf16.mxu0 %v387_v1  ;;  %383 = vmatprep.subr.bf16.mxu1 %v387_v1  ;;  %v395_v9 = vld [vmem:[%s522_s0 + $0x38] sm:$0xff]   ;;  %v301_v10 = vld [vmem:[%s523_s2] ss:$0 sm:$0xff] }
   0x5   :  { %366 = vmatprep.mubr.msk.bf16.mxu0 %vm94_vm0, %v388_v2  ;;  %374 = vmatprep.mubr.msk.bf16.mxu1 %vm94_vm0, %v389_v3 }
   0x7   :  { %365 = vmatpush3.bf16.msra.mxu0 %v387_v1  ;;  %385 = vmatpush3.bf16.msra.mxu1 %v387_v1 }
   0xa   :  { %367 = vmatmul.mubr.msk.bf16.vlgmr.msra.gmra.mrb[0].mxu0 %vm94_vm0, %v390_v4  ;;  %375 = vmatmul.mubr.msk.bf16.vlgmr.msra.gmra.mrb[0].mxu1 %vm94_vm0, %v391_v5 }
   0xb   :  { %370 = vmatprep.mubr.msk.bf16.mxu0 %vm94_vm0, %v392_v6  ;;  %378 = vmatprep.mubr.msk.bf16.mxu1 %vm94_vm0, %v393_v7 }
  0x12   :  { %371 = vmatmul.mubr.msk.bf16.gmra.mrb[4].mxu0 %vm94_vm0, %v394_v8  ;;  %379 = vmatmul.mubr.msk.bf16.gmra.mrb[4].mxu1 %vm94_vm0, %v395_v9 }
  0xdd   :  { %v368_v11 = vpop.f32.mrb[0].mxu0  ;;  %v376_v12 = vpop.f32.mrb[0].mxu1 }
  0xde   :  { %v162_v13 = vadd.f32 %v368_v11, %v301_v10  ;;  %v194_v14 = vadd.f32 %v376_v12, %v301_v10  ;;  %v153_v15 = vpop.f32.mrb[1].mxu0  ;;  %v185_v16 = vpop.f32.mrb[1].mxu1 }
  0xdf   :  { %v154_v17 = vadd.f32 %v301_v10, %v153_v15  ;;  %v186_v18 = vadd.f32 %v301_v10, %v185_v16  ;;  %v369_v19 = vpop.f32.mrb[2].mxu0  ;;  %v377_v20 = vpop.f32.mrb[2].mxu1 }
  0xe0   :  { %v338_v21 = vpack.c.bf16 %v162_v13, %v162_v13  ;;  %v346_v22 = vpack.c.bf16 %v194_v14, %v194_v14  ;;  %v165_v23 = vadd.f32 %v369_v19, %v301_v10  ;;  %v197_v24 = vadd.f32 %v377_v20, %v301_v10  ;;  %v156_v25 = vpop.f32.mrb[3].mxu0  ;;  %v188_v26 = vpop.f32.mrb[3].mxu1 }
  0xe1   :  { %v336_v27 = vpack.c.bf16 %v154_v17, %v154_v17  ;;  %v344_v28 = vpack.c.bf16 %v186_v18, %v186_v18  ;;  %v157_v29 = vadd.f32 %v301_v10, %v156_v25  ;;  %v189_v30 = vadd.f32 %v301_v10, %v188_v26 }
  0xe2   :  { %283 = vst.msk [vmem:[%s524_s3 + $0x8] sm:$0xf] %vm280_vm1, %v338_v21  ;;  %291 = vst.msk [vmem:[%s524_s3 + $0x28] sm:$0xf] %vm280_vm1, %v346_v22  ;;  %v339_v31 = vpack.c.bf16 %v165_v23, %v165_v23  ;;  %v347_v32 = vpack.c.bf16 %v197_v24, %v197_v24 }
  0xe3   :  { %281 = vst.msk [vmem:[%s524_s3] sm:$0xf] %vm280_vm1, %v336_v27  ;;  %289 = vst.msk [vmem:[%s524_s3 + $0x20] sm:$0xf] %vm280_vm1, %v344_v28  ;;  %v337_v33 = vpack.c.bf16 %v157_v29, %v157_v29  ;;  %v345_v34 = vpack.c.bf16 %v189_v30, %v189_v30 }
  0xe4   :  { %284 = vst.msk [vmem:[%s524_s3 + $0xc] sm:$0xf] %vm280_vm1, %v339_v31  ;;  %292 = vst.msk [vmem:[%s524_s3 + $0x2c] sm:$0xf] %vm280_vm1, %v347_v32 }
  0xe5   :  { %282 = vst.msk [vmem:[%s524_s3 + $0x4] sm:$0xf] %vm280_vm1, %v337_v33  ;;  %290 = vst.msk [vmem:[%s524_s3 + $0x24] sm:$0xf] %vm280_vm1, %v345_v34  ;;  %v372_v35 = vpop.f32.mrb[4].mxu0  ;;  %v380_v36 = vpop.f32.mrb[4].mxu1 }
  0xe6   :  { %v178_v37 = vadd.f32 %v372_v35, %v301_v10  ;;  %v210_v38 = vadd.f32 %v380_v36, %v301_v10  ;;  %v169_v39 = vpop.f32.mrb[5].mxu0  ;;  %v201_v40 = vpop.f32.mrb[5].mxu1 }
  0xe7   :  { %v170_v41 = vadd.f32 %v301_v10, %v169_v39  ;;  %v202_v42 = vadd.f32 %v301_v10, %v201_v40  ;;  %v373_v43 = vpop.f32.mrb[6].mxu0  ;;  %v381_v44 = vpop.f32.mrb[6].mxu1 }
  0xe8   :  { %v342_v45 = vpack.c.bf16 %v178_v37, %v178_v37  ;;  %v350_v46 = vpack.c.bf16 %v210_v38, %v210_v38  ;;  %v181_v47 = vadd.f32 %v373_v43, %v301_v10  ;;  %v213_v48 = vadd.f32 %v381_v44, %v301_v10  ;;  %v172_v49 = vpop.f32.mrb[7].mxu0  ;;  %v204_v50 = vpop.f32.mrb[7].mxu1 }
  0xe9   :  { %v340_v51 = vpack.c.bf16 %v170_v41, %v170_v41  ;;  %v348_v52 = vpack.c.bf16 %v202_v42, %v202_v42  ;;  %v173_v53 = vadd.f32 %v301_v10, %v172_v49  ;;  %v205_v54 = vadd.f32 %v301_v10, %v204_v50 }
  0xea   :  { %287 = vst.msk [vmem:[%s524_s3 + $0x18] sm:$0xf] %vm280_vm1, %v342_v45  ;;  %295 = vst.msk [vmem:[%s524_s3 + $0x38] sm:$0xf] %vm280_vm1, %v350_v46  ;;  %v343_v55 = vpack.c.bf16 %v181_v47, %v181_v47  ;;  %v351_v56 = vpack.c.bf16 %v213_v48, %v213_v48 }
  0xeb   :  { %285 = vst.msk [vmem:[%s524_s3 + $0x10] sm:$0xf] %vm280_vm1, %v340_v51  ;;  %293 = vst.msk [vmem:[%s524_s3 + $0x30] sm:$0xf] %vm280_vm1, %v348_v52  ;;  %v341_v57 = vpack.c.bf16 %v173_v53, %v173_v53  ;;  %v349_v58 = vpack.c.bf16 %v205_v54, %v205_v54 }
  0xec   :  { %288 = vst.msk [vmem:[%s524_s3 + $0x1c] sm:$0xf] %vm280_vm1, %v343_v55  ;;  %296 = vst.msk [vmem:[%s524_s3 + $0x3c] sm:$0xf] %vm280_vm1, %v351_v56 }
  0xed   :  { %286 = vst.msk [vmem:[%s524_s3 + $0x14] sm:$0xf] %vm280_vm1, %v341_v57  ;;  %294 = vst.msk [vmem:[%s524_s3 + $0x34] sm:$0xf] %vm280_vm1, %v349_v58 }

</bundles_post_ra>
